<compile_context>
chip_gen: v7x
topology: tpu7x:2x2x1
jax: 0.10.0
libtpu: 0.0.40
codegen_flags: <defaults>
</compile_context>

<pallas_src>
import jax
import jax.numpy as jnp
from jax.experimental import pallas as pl
from jax.experimental.pallas import tpu as pltpu

LANE = 128
SUBLANE = 8


# ----------------------------- Pallas kernel --------------------------------

def mlp_kernel(x_ref, w0_ref, b0_ref, w1_ref, b1_ref, wo_ref, bo_ref, o_ref):
    # x tile: (TB, D_in_pad), all BN affines pre-folded into the weights/biases
    x = x_ref[...]
    h = jnp.dot(x, w0_ref[...], preferred_element_type=jnp.float32) + b0_ref[...]
    h = jnp.maximum(h, 0.0)
    h = jnp.dot(h, w1_ref[...], preferred_element_type=jnp.float32) + b1_ref[...]
    h = jnp.maximum(h, 0.0)
    o_ref[...] = jnp.dot(h, wo_ref[...], preferred_element_type=jnp.float32) + bo_ref[...]


def run_mlp(x, w0, b0, w1, b1, wo, bo, *, tb):
    """x: (B_pad, D_in_pad). Weights already BN-folded and padded. Returns (B_pad, D_out_pad)."""
    B, D_in = x.shape
    H0 = w0.shape[1]
    H1 = w1.shape[1]
    D_out = wo.shape[1]
    assert B % tb == 0

    full = lambda shape: pl.BlockSpec(shape, lambda i: (0, 0))

    return pl.pallas_call(
        mlp_kernel,
        out_shape=jax.ShapeDtypeStruct((B, D_out), jnp.float32),
        grid=(B // tb,),
        in_specs=[
            pl.BlockSpec((tb, D_in), lambda i: (i, 0)),   # x tile over batch
            full((D_in, H0)), full((1, H0)),              # folded lin0
            full((H0, H1)), full((1, H1)),                # folded lin1
            full((H1, D_out)), full((1, D_out)),          # folded output layer
        ],
        out_specs=pl.BlockSpec((tb, D_out), lambda i: (i, 0)),
        compiler_params=pltpu.CompilerParams(
            dimension_semantics=("parallel",)),
    )(x, w0, b0, w1, b1, wo, bo)


# --------------------------- model configuration ----------------------------

# Mirrors the data-derived config in modelLendNN.py (synthetic, deterministic).
CAT_VAR_DIMS = [2, 7, 4, 3, 11]                      # term, grade, home_ownership, pred_KM, emp_length
EMB_DIMS = [(x, min(10, (x + 1) // 2)) for x in CAT_VAR_DIMS]   # [(2,1),(7,4),(4,2),(3,2),(11,6)]
NUM_FLOAT_X = 7                                       # 7 float x vars
LIN_LAYER_SIZES = [64, 32]
OUTPUT_SIZE = 3                                       # probDef, probER, fracNumPmts
BN_EPS = 1e-5


def init_params(key):
    keys = iter(jax.random.split(key, 64))
    p = {}
    # embedding tables (torch nn.Embedding init: N(0,1))
    p["emb"] = [jax.random.normal(next(keys), (n, d), jnp.float32) for n, d in EMB_DIMS]

    num_emb = sum(d for _, d in EMB_DIMS)
    d_in = num_emb + NUM_FLOAT_X

    # first BatchNorm1d over float features (eval mode, running stats)
    p["bn0_gamma"] = jax.random.normal(next(keys), (NUM_FLOAT_X,)) * 0.1 + 1.0
    p["bn0_beta"] = jax.random.normal(next(keys), (NUM_FLOAT_X,)) * 0.1
    p["bn0_mean"] = jax.random.normal(next(keys), (NUM_FLOAT_X,)) * 0.1
    p["bn0_var"] = jnp.abs(jax.random.normal(next(keys), (NUM_FLOAT_X,))) * 0.1 + 1.0

    sizes = [d_in] + LIN_LAYER_SIZES
    p["lin_w"], p["lin_b"] = [], []
    p["bn_gamma"], p["bn_beta"], p["bn_mean"], p["bn_var"] = [], [], [], []
    for i in range(len(LIN_LAYER_SIZES)):
        fan_in, fan_out = sizes[i], sizes[i + 1]
        # nn.init.normal_(weight) in the reference; store as (in, out) for x @ W
        p["lin_w"].append(jax.random.normal(next(keys), (fan_in, fan_out), jnp.float32))
        p["lin_b"].append(jax.random.normal(next(keys), (fan_out,), jnp.float32) * 0.1)
        p["bn_gamma"].append(jax.random.normal(next(keys), (fan_out,)) * 0.1 + 1.0)
        p["bn_beta"].append(jax.random.normal(next(keys), (fan_out,)) * 0.1)
        p["bn_mean"].append(jax.random.normal(next(keys), (fan_out,)) * 0.1)
        p["bn_var"].append(jnp.abs(jax.random.normal(next(keys), (fan_out,))) * 0.1 + 1.0)

    p["out_w"] = jax.random.normal(next(keys), (LIN_LAYER_SIZES[-1], OUTPUT_SIZE), jnp.float32)
    p["out_b"] = jax.random.normal(next(keys), (OUTPUT_SIZE,)) * 0.1
    return p


def bn_fold(gamma, beta, mean, var, eps=BN_EPS):
    scale = gamma / jnp.sqrt(var + eps)
    shift = beta - mean * scale
    return scale, shift


def _round_up(n, m):
    return ((n + m - 1) // m) * m


def _pick_batch_tile(B):
    # Big tiles amortize the ~0.35 us per-grid-step overhead; keep >= 2 grid
    # steps so both v7x TensorCores get work; cap tile rows at 512.
    if B <= SUBLANE:
        return SUBLANE
    return min(512, _round_up(pl.cdiv(B, 2), SUBLANE))


def custom_nn_forward(params, float_x, cat_x):
    """float_x: (B, 7) float32, cat_x: (B, 5) int32. Returns (B, 3) float32."""
    B = float_x.shape[0]

    # glue: embedding lookups + concat (emb dropout is identity in eval).
    # TODO(synk): the tiny gather/concat could be fused in-kernel via scalar
    # prefetch, but tables total <1 KB so it stays in JAX glue here.
    emb_parts = [params["emb"][i][cat_x[:, i]] for i in range(len(EMB_DIMS))]
    x_emb = jnp.concatenate(emb_parts, axis=1)                 # (B, num_emb)
    num_emb = x_emb.shape[1]
    x_full = jnp.concatenate([x_emb, float_x], axis=1)         # (B, num_emb + 7)
    d_in = x_full.shape[1]

    # first BN applies only to the float columns -> per-input-column affine
    s0f, t0f = bn_fold(params["bn0_gamma"], params["bn0_beta"],
                       params["bn0_mean"], params["bn0_var"])
    in_s = jnp.concatenate([jnp.ones((num_emb,), jnp.float32), s0f])
    in_t = jnp.concatenate([jnp.zeros((num_emb,), jnp.float32), t0f])

    s_l0, t_l0 = bn_fold(params["bn_gamma"][0], params["bn_beta"][0],
                         params["bn_mean"][0], params["bn_var"][0])
    s_l1, t_l1 = bn_fold(params["bn_gamma"][1], params["bn_beta"][1],
                         params["bn_mean"][1], params["bn_var"][1])

    # Fold every BN affine into the adjacent Linear (wrapper-side, once):
    #   (x*s + t) @ W + b  ==  x @ (diag(s) W) + (t @ W + b)
    w0 = in_s[:, None] * params["lin_w"][0]
    b0 = in_t @ params["lin_w"][0] + params["lin_b"][0]
    w1 = s_l0[:, None] * params["lin_w"][1]
    b1 = t_l0 @ params["lin_w"][1] + params["lin_b"][1]
    wo = s_l1[:, None] * params["out_w"]
    bo = t_l1 @ params["out_w"] + params["out_b"]

    # Lane-friendly padding (zeros are inert in the dots / ReLU):
    #   D_in: 22 -> 128 (aligned K / aligned x loads)
    #   D_out: 3 -> 128 (lane-dense output stores, no vst.msk)
    d_in_pad = _round_up(d_in, LANE)
    d_out = wo.shape[1]
    d_out_pad = _round_up(d_out, LANE)

    tb = _pick_batch_tile(B)
    b_pad = _round_up(B, tb)

    x_p = jnp.zeros((b_pad, d_in_pad), jnp.float32).at[:B, :d_in].set(x_full)
    w0_p = jnp.zeros((d_in_pad, w0.shape[1]), jnp.float32).at[:d_in, :].set(w0)
    wo_p = jnp.zeros((wo.shape[0], d_out_pad), jnp.float32).at[:, :d_out].set(wo)
    bo_p = jnp.zeros((1, d_out_pad), jnp.float32).at[0, :d_out].set(bo)

    # TODO(synk): training-mode stochastic dropout / batch-statistics BN are
    # not reproduced (inference semantics only). Weights kept f32 (bf16 would
    # save ~7 KB of DMA here — negligible — and loosen accuracy).
    out = run_mlp(
        x_p,
        w0_p, b0.reshape(1, -1),
        w1, b1.reshape(1, -1),
        wo_p, bo_p,
        tb=tb,
    )
    return out[:B, :d_out]


# pure-JAX reference for validation
def reference_forward(params, float_x, cat_x):
    emb_parts = [params["emb"][i][cat_x[:, i]] for i in range(len(EMB_DIMS))]
    x = jnp.concatenate(emb_parts, axis=1)
    s0f, t0f = bn_fold(params["bn0_gamma"], params["bn0_beta"],
                       params["bn0_mean"], params["bn0_var"])
    x = jnp.concatenate([x, float_x * s0f + t0f], axis=1)
    for i in range(len(LIN_LAYER_SIZES)):
        x = jnp.maximum(x @ params["lin_w"][i] + params["lin_b"][i], 0.0)
        s, t = bn_fold(params["bn_gamma"][i], params["bn_beta"][i],
                       params["bn_mean"][i], params["bn_var"][i])
        x = x * s + t
    return x @ params["out_w"] + params["out_b"]


def _make_inputs(key, B):
    k_float, k_cat = jax.random.split(key, 2)
    float_x = jax.random.normal(k_float, (B, NUM_FLOAT_X), jnp.float32)
    cat_keys = jax.random.split(k_cat, len(CAT_VAR_DIMS))
    cat_x = jnp.stack(
        [jax.random.randint(cat_keys[i], (B,), 0, CAT_VAR_DIMS[i], jnp.int32)
         for i in range(len(CAT_VAR_DIMS))], axis=1)
    return float_x, cat_x


if __name__ == "__main__":
    key = jax.random.PRNGKey(0)
    k_param, k_small, k_big = jax.random.split(key, 3)

    params = init_params(k_param)

    # small-shape check (B=16 -> two 8-row tiles, exercises the >=2-step grid)
    B = 16
    float_x, cat_x = _make_inputs(k_small, B)
    out = jax.block_until_ready(custom_nn_forward(params, float_x, cat_x))
    ref = reference_forward(params, float_x, cat_x)
    assert out.shape == (B, OUTPUT_SIZE)
    assert jnp.allclose(out, ref, atol=1e-4, rtol=1e-4), "mismatch vs JAX reference (B=16)"

    # non-divisible batch check (exercises the batch padding + large-tile path)
    B2 = 260
    float_x2, cat_x2 = _make_inputs(k_big, B2)
    out2 = jax.block_until_ready(custom_nn_forward(params, float_x2, cat_x2))
    ref2 = reference_forward(params, float_x2, cat_x2)
    assert out2.shape == (B2, OUTPUT_SIZE)
    assert jnp.allclose(out2, ref2, atol=1e-4, rtol=1e-4), "mismatch vs JAX reference (B=260)"

    print("KERNEL_OK")
</pallas_src>

<mosaic_0001>
module attributes {stable_mosaic.version = 11 : i64} {
  func.func @mlp_kernel(%arg0: i32, %arg1: memref<8x128xf32, #tpu.memory_space<vmem>>, %arg2: memref<128x64xf32, #tpu.memory_space<vmem>>, %arg3: memref<1x64xf32, #tpu.memory_space<vmem>>, %arg4: memref<64x32xf32, #tpu.memory_space<vmem>>, %arg5: memref<1x32xf32, #tpu.memory_space<vmem>>, %arg6: memref<32x128xf32, #tpu.memory_space<vmem>>, %arg7: memref<1x128xf32, #tpu.memory_space<vmem>>, %arg8: memref<8x128xf32, #tpu.memory_space<vmem>>) attributes {dimension_semantics = [#tpu.dimension_semantics<parallel>], iteration_bounds = array<i64: 2>, scalar_prefetch = 0 : i64, scratch_operands = 0 : i64, tpu.core_type = #tpu.core_type<tc>, window_params = [{transform_indices = @transform_0, window_bounds = array<i64: 8, 128>}, {pipeline_mode = #tpu.pipeline_mode<synchronous>, transform_indices = @transform_1, window_bounds = array<i64: 128, 64>}, {pipeline_mode = #tpu.pipeline_mode<synchronous>, transform_indices = @transform_2, window_bounds = array<i64: 1, 64>}, {pipeline_mode = #tpu.pipeline_mode<synchronous>, transform_indices = @transform_3, window_bounds = array<i64: 64, 32>}, {pipeline_mode = #tpu.pipeline_mode<synchronous>, transform_indices = @transform_4, window_bounds = array<i64: 1, 32>}, {pipeline_mode = #tpu.pipeline_mode<synchronous>, transform_indices = @transform_5, window_bounds = array<i64: 32, 128>}, {pipeline_mode = #tpu.pipeline_mode<synchronous>, transform_indices = @transform_6, window_bounds = array<i64: 1, 128>}, {transform_indices = @transform_7, window_bounds = array<i64: 8, 128>}]} {
    %c0 = arith.constant 0 : index
    %c0_0 = arith.constant 0 : index
    %0 = vector.load %arg1[%c0, %c0_0] : memref<8x128xf32, #tpu.memory_space<vmem>>, vector<8x128xf32>
    %c0_1 = arith.constant 0 : index
    %c0_2 = arith.constant 0 : index
    %1 = vector.load %arg2[%c0_1, %c0_2] : memref<128x64xf32, #tpu.memory_space<vmem>>, vector<128x64xf32>
    %cst = arith.constant dense<0.000000e+00> : vector<8x64xf32>
    %2 = tpu.matmul %0, %1, %cst {dimension_numbers = #tpu.dot_dimension_numbers<[1], [0], [0], [1], [0, 0, 1, 1], [], []>} : vector<8x128xf32>, vector<128x64xf32>, vector<8x64xf32> -> vector<8x64xf32>
    %c0_3 = arith.constant 0 : index
    %c0_4 = arith.constant 0 : index
    %3 = vector.load %arg3[%c0_3, %c0_4] : memref<1x64xf32, #tpu.memory_space<vmem>>, vector<1x64xf32>
    %4 = vector.broadcast %3 : vector<1x64xf32> to vector<8x64xf32>
    %5 = arith.addf %2, %4 : vector<8x64xf32>
    %cst_5 = arith.constant 0.000000e+00 : f32
    %6 = vector.broadcast %cst_5 : f32 to vector<8x64xf32>
    %7 = arith.maximumf %5, %6 : vector<8x64xf32>
    %c0_6 = arith.constant 0 : index
    %c0_7 = arith.constant 0 : index
    %8 = vector.load %arg4[%c0_6, %c0_7] : memref<64x32xf32, #tpu.memory_space<vmem>>, vector<64x32xf32>
    %cst_8 = arith.constant dense<0.000000e+00> : vector<8x32xf32>
    %9 = tpu.matmul %7, %8, %cst_8 {dimension_numbers = #tpu.dot_dimension_numbers<[1], [0], [0], [1], [0, 0, 1, 1], [], []>} : vector<8x64xf32>, vector<64x32xf32>, vector<8x32xf32> -> vector<8x32xf32>
    %c0_9 = arith.constant 0 : index
    %c0_10 = arith.constant 0 : index
    %10 = vector.load %arg5[%c0_9, %c0_10] : memref<1x32xf32, #tpu.memory_space<vmem>>, vector<1x32xf32>
    %11 = vector.broadcast %10 : vector<1x32xf32> to vector<8x32xf32>
    %12 = arith.addf %9, %11 : vector<8x32xf32>
    %cst_11 = arith.constant 0.000000e+00 : f32
    %13 = vector.broadcast %cst_11 : f32 to vector<8x32xf32>
    %14 = arith.maximumf %12, %13 : vector<8x32xf32>
    %c0_12 = arith.constant 0 : index
    %c0_13 = arith.constant 0 : index
    %15 = vector.load %arg6[%c0_12, %c0_13] : memref<32x128xf32, #tpu.memory_space<vmem>>, vector<32x128xf32>
    %cst_14 = arith.constant dense<0.000000e+00> : vector<8x128xf32>
    %16 = tpu.matmul %14, %15, %cst_14 {dimension_numbers = #tpu.dot_dimension_numbers<[1], [0], [0], [1], [0, 0, 1, 1], [], []>} : vector<8x32xf32>, vector<32x128xf32>, vector<8x128xf32> -> vector<8x128xf32>
    %c0_15 = arith.constant 0 : index
    %c0_16 = arith.constant 0 : index
    %17 = vector.load %arg7[%c0_15, %c0_16] : memref<1x128xf32, #tpu.memory_space<vmem>>, vector<1x128xf32>
    %18 = vector.broadcast %17 : vector<1x128xf32> to vector<8x128xf32>
    %19 = arith.addf %16, %18 : vector<8x128xf32>
    %c0_17 = arith.constant 0 : index
    %c0_18 = arith.constant 0 : index
    %20 = vector.load %arg8[%c0_17, %c0_18] : memref<8x128xf32, #tpu.memory_space<vmem>>, vector<8x128xf32>
    tpu.vector_store %arg8[%c0_17, %c0_18], %19 {strides = array<i32>} : memref<8x128xf32, #tpu.memory_space<vmem>>, vector<8x128xf32>,
    return
  }
  func.func @transform_0(%arg0: i32) -> (i32, i32) {
    %c0_i32 = arith.constant 0 : i32
    %c0_i32_0 = arith.constant 0 : i32
    return %arg0, %c0_i32 : i32, i32
  }
  func.func @transform_1(%arg0: i32) -> (i32, i32) {
    %c0_i32 = arith.constant 0 : i32
    %c0_i32_0 = arith.constant 0 : i32
    %c0_i32_1 = arith.constant 0 : i32
    return %c0_i32, %c0_i32_0 : i32, i32
  }
  func.func @transform_2(%arg0: i32) -> (i32, i32) {
    %c0_i32 = arith.constant 0 : i32
    %c0_i32_0 = arith.constant 0 : i32
    %c0_i32_1 = arith.constant 0 : i32
    return %c0_i32, %c0_i32_0 : i32, i32
  }
  func.func @transform_3(%arg0: i32) -> (i32, i32) {
    %c0_i32 = arith.constant 0 : i32
    %c0_i32_0 = arith.constant 0 : i32
    %c0_i32_1 = arith.constant 0 : i32
    return %c0_i32, %c0_i32_0 : i32, i32
  }
  func.func @transform_4(%arg0: i32) -> (i32, i32) {
    %c0_i32 = arith.constant 0 : i32
    %c0_i32_0 = arith.constant 0 : i32
    %c0_i32_1 = arith.constant 0 : i32
    return %c0_i32, %c0_i32_0 : i32, i32
  }
  func.func @transform_5(%arg0: i32) -> (i32, i32) {
    %c0_i32 = arith.constant 0 : i32
    %c0_i32_0 = arith.constant 0 : i32
    %c0_i32_1 = arith.constant 0 : i32
    return %c0_i32, %c0_i32_0 : i32, i32
  }
  func.func @transform_6(%arg0: i32) -> (i32, i32) {
    %c0_i32 = arith.constant 0 : i32
    %c0_i32_0 = arith.constant 0 : i32
    %c0_i32_1 = arith.constant 0 : i32
    return %c0_i32, %c0_i32_0 : i32, i32
  }
  func.func @transform_7(%arg0: i32) -> (i32, i32) {
    %c0_i32 = arith.constant 0 : i32
    %c0_i32_0 = arith.constant 0 : i32
    return %arg0, %c0_i32 : i32, i32
  }
}

</mosaic_0001>

<bundles_post_ra>
// kernel: tpu_custom_call.1
= control target key start
LH: loop header
LB: loop body
LE: loop exit
PB: predicated region body
PF: predicated region fallthrough
CT: control target
= control target key end

     0   :  { %12 = vsyncpa [#allocation3], 0  ;;  %s1134_s0 = inlined_call_operand.vmem [shape: f32[16,128], index: 0, kind: input, shape index: {}]   ;;  %s1135_s1 = inlined_call_operand.vmem [shape: f32[128,64], index: 1, kind: input, shape index: {}]   ;;  %s1136_s2 = inlined_call_operand.vmem [shape: f32[1,64], index: 2, kind: input, shape index: {}]   ;;  %s1137_s3 = inlined_call_operand.vmem [shape: f32[64,32], index: 3, kind: input, shape index: {}]   ;;  %s1138_s4 = inlined_call_operand.vmem [shape: f32[1,32], index: 4, kind: input, shape index: {}]   ;;  %s1139_s5 = inlined_call_operand.vmem [shape: f32[32,128], index: 5, kind: input, shape index: {}]   ;;  %s1140_s6 = inlined_call_operand.vmem [shape: f32[1,128], index: 6, kind: input, shape index: {}]   ;;  %s1141_s7 = inlined_call_operand.hbm [shape: f32[16,128], index: 7, kind: output, shape index: {}]  }
   0x1   :  { %14 = vsyncpa [#allocation3 + $0x1], 0  ;;  %s921_s24 = smov 0   ;;  %s923_s25 = smov 0  }
   0x2   :  { %s925_s26 = smov 0   ;;  %s927_s27 = smov 0  }
   0x3 LB: > { %s942_s28 = sadd.s32 4294967295, %s875_s27   ;;  %s618_s29 = sadd.s32 4294967294, %s875_s27   ;;  %s875_s27 = sphi %s927_s27, %s1147_s27   ;;  %s871_s26 = sphi %s925_s26, %s1146_s26   ;;  %s867_s25 = sphi %s923_s25, %s1145_s25   ;;  %s863_s24 = sphi %s921_s24, %s1144_s24  }
   0x4   : > { %s946_s30 = sadd.s32 1, %s875_s27   ;;  %s179_s8 = sadd.s32 1, %s871_s26 }
   0x5   : > { %s176_s9 = ssub.s32 %s875_s27, %s946_s30  ;;  %p189_p0 = scmp.ne.s32.totalorder %s871_s26, %s867_s25 }
   0x6   : > { %p177_p1 = scmp.eq.s32.totalorder %s176_s9, 0  ;;  %p190_p2 = scmp.eq.s32.totalorder %s942_s28, 1 }
   0x7   : > { %p195_p3 = scmp.ne.s32.totalorder %s867_s25, %s863_s24  ;;  %p196_p4 = scmp.eq.s32.totalorder %s618_s29, 1 }
   0x8   : > { %s957_s10 = scalar_select %p177_p1, %s871_s26, %s179_s8  }
   0x9   : > { %p959_p5 = por %p190_p2, %p189_p0  ;;  %p963_p6 = por %p196_p4, %p195_p3 }
   0xa   : > { %p621_p7 = scmp.ge.s32.totalorder %s875_s27, 1  ;;  %p239_p8 = scmp.lt.s32.totalorder %s875_s27, 3 }
   0xc   : > { %p240_p9 = pnand %p621_p7, %p239_p8 }
   0xd   : > { %v275_v0 = vld [vmem:[%s1135_s1] sm:$0xff] (!%p240_p9)  ;;  %v276_v1 = vld [vmem:[%s1135_s1 + $0x8] sm:$0xff] (!%p240_p9)  ;;  %v277_v2 = vld [vmem:[%s1135_s1 + $0x10] sm:$0xff] (!%p240_p9)  ;;  %v877_v3 = vmov (!%p240_p9), 0.0|0.0   ;;  %vm878_vm0 = vmmov (!%p240_p9), 0   ;;  %v879_v6 = vmov (!%p240_p9), 0.0  }
   0xe   : > { %243 = sbr.rel (%p240_p9) target bundleno = 707 (0x2c3), region = 48  ;;  %729 = vmatprep.subr.bf16.mxu0 (!%p240_p9), %v877_v3  ;;  %v730_v4 = vpack.c.bf16 (!%p240_p9), %v276_v1, %v275_v0  ;;  %v278_v5 = vld [vmem:[%s1135_s1 + $0x18] sm:$0xff] (!%p240_p9)  ;;  %696 = vmatprep.mubr.msk.f32.mxu0 (!%p240_p9), %vm878_vm0, %v879_v6  ;;  %v279_v8 = vld [vmem:[%s1135_s1 + $0x20] sm:$0xff] (!%p240_p9)  ;;  %v280_v9 = vld [vmem:[%s1135_s1 + $0x28] sm:$0xff] (!%p240_p9)  ;;  %p270_p10 = scmp.lt.s32.totalorder (!%p240_p9), %s942_s28, 1  ;;  %vm384_vm1 = vcmask (!%p240_p9), 523264  }
   0xf   : > { %753 = vmatprep.subr.bf16.mxu1 (!%p240_p9), %v877_v3  ;;  %715 = vmatprep.mubr.msk.f32.mxu1 (!%p240_p9), %vm878_vm0, %v879_v6  ;;  %v733_v7 = vpack.c.bf16 (!%p240_p9), %v278_v5, %v277_v2  ;;  %v369_v10 = vld [vmem:[%s1137_s3] sm:$0xff] (!%p240_p9)  ;;  %v370_v11 = vld [vmem:[%s1137_s3 + $0x8] sm:$0xff] (!%p240_p9)  ;;  %v371_v13 = vld [vmem:[%s1137_s3 + $0x10] sm:$0xff] (!%p240_p9)  ;;  %v736_v15 = vpack.c.bf16 (!%p240_p9), %v280_v9, %v279_v8  ;;  %vm470_vm2 = vcmask (!%p240_p9), 261120   ;;  %s267_s22 = sand.u32 (!%p240_p9), 1, %s867_s25   ;;  %s630_s9 = sshll.u32 (!%p240_p9), %s942_s28, 7 }
  0x10   : > { %731 = vmatpush3.bf16.msra.mxu0 (!%p240_p9), %v730_v4  ;;  %v754_v12 = vpack.c.bf16 (!%p240_p9), %v370_v11, %v369_v10  ;;  %v372_v14 = vld [vmem:[%s1137_s3 + $0x18] sm:$0xff] (!%p240_p9)  ;;  %v281_v16 = vld [vmem:[%s1135_s1 + $0x30] sm:$0xff] (!%p240_p9)  ;;  %v373_v19 = vld [vmem:[%s1137_s3 + $0x20] sm:$0xff] (!%p240_p9)  ;;  %s622_s23 = sshll.u32 (!%p240_p9), %s267_s22, 3  ;;  %s1092_s17 = scalar_lea.hbm (!%p240_p9), %s1141_s7, %s630_s9 }
  0x11   : > { %732 = vmatprep.subr.bf16.mxu0 (!%p240_p9), %v877_v3  ;;  %v282_v17 = vld [vmem:[%s1135_s1 + $0x38] sm:$0xff] (!%p240_p9)  ;;  %v757_v18 = vpack.c.bf16 (!%p240_p9), %v372_v14, %v371_v13  ;;  %v374_v20 = vld [vmem:[%s1137_s3 + $0x28] sm:$0xff] (!%p240_p9)  ;;  %v283_v22 = vld [vmem:[%s1135_s1 + $0x40] sm:$0xff] (!%p240_p9)  ;;  %s269_s13 = scalar_lea.vmem (!%p240_p9), [#allocation2], %s622_s23  ;;  %s546_s18 = scalar_lea.sflag (!%p240_p9), [#allocation3], %s267_s22 }
  0x12   : > { %755 = vmatpush3.bf16.msra.mxu1 (!%p240_p9), %v754_v12  ;;  %v739_v21 = vpack.c.bf16 (!%p240_p9), %v282_v17, %v281_v16  ;;  %v284_v23 = vld [vmem:[%s1135_s1 + $0x48] sm:$0xff] (!%p240_p9)  ;;  %v760_v24 = vpack.c.bf16 (!%p240_p9), %v374_v20, %v373_v19  ;;  %v285_v26 = vld [vmem:[%s1135_s1 + $0x50] sm:$0xff] (!%p240_p9)  ;;  %v286_v27 = vld [vmem:[%s1135_s1 + $0x58] sm:$0xff] (!%p240_p9)  ;;  %s559_s14 = sshll.u32 (!%p240_p9), %s269_s13, 4  ;;  %s1094_s14 = int_to_ptr.vmem [resolvable:$true] %s559_s14 }
  0x13   : > { %756 = vmatprep.subr.bf16.mxu1 (!%p240_p9), %v877_v3  ;;  %v742_v25 = vpack.c.bf16 (!%p240_p9), %v284_v23, %v283_v22  ;;  %v745_v28 = vpack.c.bf16 (!%p240_p9), %v286_v27, %v285_v26  ;;  %v287_v29 = vld [vmem:[%s1135_s1 + $0x60] sm:$0xff] (!%p240_p9)  ;;  %v288_v30 = vld [vmem:[%s1135_s1 + $0x68] sm:$0xff] (!%p240_p9)  ;;  %v289_v32 = vld [vmem:[%s1135_s1 + $0x70] sm:$0xff] (!%p240_p9) }
  0x14   : > { %734 = vmatpush3.bf16.msra.mxu0 (!%p240_p9), %v733_v7  ;;  %v748_v31 = vpack.c.bf16 (!%p240_p9), %v288_v30, %v287_v29  ;;  %v290_v33 = vld [vmem:[%s1135_s1 + $0x78] sm:$0xff] (!%p240_p9)  ;;  %v375_v36 = vld [vmem:[%s1137_s3 + $0x30] sm:$0xff] (!%p240_p9)  ;;  %v624_v39 = vld [vmem:[%s1136_s2] ss:$0 sm:$0xff] (!%p240_p9) }
  0x15   : > { %735 = vmatprep.subr.bf16.mxu0 %v877_v3  ;;  %s271_s8 = scalar_select %p270_p10, %s942_s28, 1  ;;  %v751_v34 = vpack.c.bf16 %v290_v33, %v289_v32  ;;  %v376_v37 = vld [vmem:[%s1137_s3 + $0x38] sm:$0xff]  ;;  %v459_v40 = vld [vmem:[%s1139_s5] sm:$0xff]  ;;  %v460_v41 = vld [vmem:[%s1139_s5 + $0x8] sm:$0xff] }
  0x16   : > { %758 = vmatpush3.bf16.msra.mxu1 %v757_v18  ;;  %v763_v38 = vpack.c.bf16 %v376_v37, %v375_v36  ;;  %v766_v45 = vpack.c.bf16 %v460_v41, %v459_v40  ;;  %v461_v47 = vld [vmem:[%s1139_s5 + $0x10] sm:$0xff]  ;;  %v462_v48 = vld [vmem:[%s1139_s5 + $0x18] sm:$0xff]  ;;  %v625_v50 = vld [vmem:[%s1138_s4] ss:$0 sm:$0xff]  ;;  %s880_s28 = smov [#allocation2]  }
  0x17   : > { %759 = vmatprep.subr.bf16.mxu1 %v877_v3  ;;  %s623_s16 = sshll.u32 %s271_s8, 3  ;;  %v769_v49 = vpack.c.bf16 %v462_v48, %v461_v47  ;;  %v627_v55 = vld [vmem:[%s1140_s6] ss:$0 sm:$0xff]  ;;  %s817_s20 = sshll.u32 %s880_s28, 4  ;;  %s818_s20 = int_to_ptr.vmem [resolvable:$false] %s817_s20 }
  0x18   : > { %737 = vmatpush3.bf16.msra.mxu0 %v736_v15  ;;  %s273_s19 = scalar_lea.vmem %s1134_s0, %s623_s16  ;;  %s819_s21 = scalar_lea.vmem %s818_s20, 256 }
  0x19   : > { %738 = vmatprep.subr.bf16.mxu0 %v877_v3  ;;  %v274_v35 = vld [vmem:[%s273_s19] sm:$0xff]  ;;  %s813_s19 = scalar_lea.vmem %s1094_s14, 128  ;;  %p820_p0 = scmp.lt.s32.totalorder %s1094_s14, %s818_s20 }
  0x1a   : > { %761 = vmatpush3.bf16.msra.mxu1 %v760_v24  ;;  %p814_p11 = scmp.ne.s32.totalorder %s1094_s14, %s813_s19  ;;  %p821_p1 = scmp.lt.s32.totalorder %s819_s21, %s813_s19 }
  0x1b   : > { %762 = vmatprep.subr.bf16.mxu1 %v877_v3 }
  0x1c   : > { %740 = vmatpush3.bf16.msra.mxu0 %v739_v21  ;;  %p815_p12 = pnand %p814_p11, %p959_p5  ;;  %p822_p2 = por %p821_p1, %p820_p0 }
  0x1d   : > { %741 = vmatprep.subr.bf16.mxu0 %v877_v3 }
  0x1e   : > { %764 = vmatpush3.bf16.msra.mxu1 %v763_v38  ;;  %p816_p13 = pneg %p815_p12 }
  0x1f   : > { %765 = vmatprep.subr.bf16.mxu1 %v877_v3 }
  0x20   : > { %743 = vmatpush3.bf16.msra.mxu0 %v742_v25  ;;  %p823_p3 = pnand %p822_p2, %p816_p13 }
  0x21   : > { %744 = vmatprep.subr.bf16.mxu0 %v877_v3 }
  0x24   : > { %746 = vmatpush3.bf16.msra.mxu0 %v745_v28 }
  0x25   : > { %747 = vmatprep.subr.bf16.mxu0 %v877_v3 }
  0x28   : > { %749 = vmatpush3.bf16.msra.mxu0 %v748_v31 }
  0x29   : > { %750 = vmatprep.subr.bf16.mxu0 %v877_v3 }
  0x2c   : > { %752 = vmatpush3.bf16.msra.mxu0 %v751_v34 }
  0x2f   : > { %697 = vmatmul.mubr.f32.vlgmr.msra.gmra.mrb[0].mxu0 %v274_v35 }
 0x102   : > { %v364_v42 = vpop.f32.mrb[0].mxu0 }
 0x103   : > { %v365_v43 = vadd.f32 %v624_v39, %v364_v42  ;;  %v698_v44 = vpop.f32.mrb[1].mxu0 }
 0x105   : > { %v368_v46 = vmax.f32 %v365_v43, 0.0 }
 0x107   : > { %716 = vmatmul.mubr.msk.f32.vlgmr.msra.gmra.mrb[0].mxu1 %vm384_vm1, %v368_v46 }
 0x108   : > { %767 = vmatpush3.bf16.msra.mxu1 %v766_v45  ;;  %726 = vmatprep.mubr.msk.f32.mxu1 %vm878_vm0, %v879_v6 }
 0x109   : > { %768 = vmatprep.subr.bf16.mxu1 %v877_v3 }
 0x10c   : > { %770 = vmatpush3.bf16.msra.mxu1 %v769_v49 }
 0x1da   : > { %v454_v51 = vpop.f32.mrb[0].mxu1 }
 0x1db   : > { %v455_v52 = vadd.f32 %v625_v50, %v454_v51  ;;  %v717_v53 = vpop.f32.mrb[1].mxu1 }
 0x1dd   : > { %v458_v54 = vmax.f32 %v455_v52, 0.0 }
 0x1df   : > { %727 = vmatmul.mubr.msk.f32.vlgmr.msra.gmra.mrb[2].mxu1 %vm470_vm2, %v458_v54 }
 0x2b2   : > { %v540_v56 = vpop.f32.mrb[2].mxu1 }
 0x2b3   : > { %v541_v57 = vadd.f32 %v627_v55, %v540_v56  ;;  %v728_v58 = vpop.f32.mrb[3].mxu1 }
 0x2b5   : > { %544 = vst [vmem:[%s269_s13] sm:$0xff] %v541_v57 }
 0x2b6   : > { %826 = shalt.err (!%p823_p3)
}
 0x2b7   : > { %s827_s22 = scalar_lea.hbm %s1092_s17, 128  ;;  %s831_s8 = scalar_lea.hbm %s1141_s7, 256 }
 0x2b8   : > { %p828_p4 = scmp.ne.s32.totalorder %s1092_s17, %s827_s22  ;;  %p832_p9 = scmp.lt.u32.totalorder %s1092_s17, %s1141_s7 }
 0x2b9   : > { %p833_p10 = scmp.lt.u32.totalorder %s831_s8, %s827_s22  ;;  %p835_p12 = scmp.lt.u32.totalorder %s827_s22, %s1092_s17 }
 0x2ba   : > { %p829_p7 = pnand %p828_p4, %p959_p5 }
 0x2bb   : > { %p834_p11 = por %p833_p10, %p832_p9 }
 0x2bc   : > { %p830_p8 = pneg %p829_p7 }
 0x2bd   : > { %p836_p13 = por %p835_p12, %p834_p11 }
 0x2bf   : > { %p837_p0 = pnand %p836_p13, %p830_p8 }
 0x2c1   : > { %840 = shalt.err (!%p837_p0)
}
 0x2c2   : > { %771 = dma.vmem_to_hbm [thread:$0]  (%p959_p5), %s1094_s14, 128, %s1092_s17, %s546_s18  }
 0x2c3 PF: > { %p777_p1 = scmp.ge.s32.totalorder %s875_s27, 2  ;;  %s571_s15 = sand.u32 1, %s863_s24  }
 0x2c4   : > { %s572_s16 = scalar_lea.sflag [#allocation3], %s571_s15 }
 0x2c5   : > { %p774_p2 = pnand %p777_p1, %p963_p6 }
 0x2c7   : > { %858 = dma.done.wait (!%p774_p2), %s572_s16, 128  }
 0x2c8   : > { %860 = vsyncadd (!%p774_p2), %s572_s16, 4294967168  ;;  %p17_p3 = scmp.ge.s32.totalorder %s946_s30, 4   ;;  %s1144_s24 = smov %s867_s25 }
 0x2c9   : > { %s1145_s25 = smov %s871_s26  ;;  %s1146_s26 = smov %s957_s10 }
 0x2ca   : > { %s1147_s27 = smov %s946_s30  ;;  %19 = sbr.rel (!%p17_p3) target bundleno = 3 (0x3), region = 83 }
 0x2d1   :  { %577 = vsyncpa [#allocation3], 1 }
 0x2d2   :  { %579 = vsyncpa [#allocation3 + $0x1], 1 }

</bundles_post_ra>
